<compile_context>
chip_gen: v6e
topology: v6e:2x2x1
jax: 0.10.0
libtpu: 0.0.40
codegen_flags: <defaults>
</compile_context>

<pallas_src>
import math
import numpy as np
import jax
import jax.numpy as jnp
from jax.experimental import pallas as pl
from jax.experimental.pallas import tpu as pltpu


# ---------------------------------------------------------------------------
# Pallas kernel: fused fourier conditioning, lane-dense slab output
# ---------------------------------------------------------------------------
def _make_kernel(use_lin):
    def kernel(c_ref, e_ref, const_ref, out_ref):
        # c_ref:     (TB, C_pad)              packed conditioning rows (zero-padded cols)
        # e_ref:     (n_mats, C_pad, W_slab)  constant expansion matrices [coef(, lin)]
        # const_ref: (2, W_slab)              row 0 = per-lane phase, row 1 = per-lane bias
        # out_ref:   (TB, W_slab)             lane-dense slab, W_slab = R * num_ws * dims
        c = c_ref[...]
        arg = jnp.dot(c, e_ref[0], preferred_element_type=jnp.float32) + const_ref[0:1, :]
        val = jnp.sin(arg) + const_ref[1:2, :]
        if use_lin:
            val = val + jnp.dot(c, e_ref[1], preferred_element_type=jnp.float32)
        out_ref[...] = val.astype(out_ref.dtype)
    return kernel


# ---------------------------------------------------------------------------
# Frequencies (mirrors ConditioningTransform.get_frequencies for 'fourier')
# ---------------------------------------------------------------------------
def get_frequencies(f_manual, explicit_lin):
    freqs = list(f_manual)
    if explicit_lin:
        # explicit-lin fixup assumes the -1.0 sentinel sorts to index 0
        assert all(f > -1.0 for f in freqs), \
            "explicit_lin requires all manual frequencies > -1.0"
        freqs = [-1.0] + freqs
    return np.sort(np.asarray(freqs, dtype=np.float32)).astype(np.float32)


# ---------------------------------------------------------------------------
# Wrapper: constant construction, lane packing, adaptive batch tiling
# ---------------------------------------------------------------------------
def conditioning_transform(c, *, f_manual, explicit_lin, lin_lr, num_ws,
                           broadcast=True, out_dtype=jnp.float32,
                           target_block_bytes=2 << 20):
    """c: (B, 1) or (B, num_f) float32. Returns (B, num_ws, 2*num_f)."""
    freqs = get_frequencies(f_manual, explicit_lin)
    num_f = int(freqs.shape[0])
    dims = 2 * num_f
    B, fc = c.shape
    assert fc in (1, num_f), "Invalid c shape - supported: (B,1) or (B,#freq)"
    assert broadcast and num_ws is not None
    W = num_ws * dims

    # ---- lane packing: fold R batch rows per slab row so the minor dim is a
    # multiple of 128 (unmasked stores). Fall back to R=1 if B is not divisible.
    R = math.lcm(W, 128) // W
    if R > 1 and (B % R != 0):
        R = 1
    W_slab = R * W
    B_rows = B // R
    C = R * fc
    C_pad = max(8, -(-C // 8) * 8)            # contraction dim rounded to sublane multiple

    # ---- per-lane / per-matrix constants (built once on host) --------------
    # even lane (2k):  cos(2*pi*f_k*c) == sin(2*pi*f_k*c + pi/2)
    # odd  lane (2k+1): sin(2*pi*f_k*c)
    # explicit-lin lanes (k==0): cos slot -> exact 1.0 via bias; sin slot -> lin_lr*c via E_lin
    phase_d = np.tile(np.asarray([np.pi / 2, 0.0], np.float32), num_f)   # (dims,)
    bias_d = np.zeros((dims,), np.float32)
    blk_coef = np.zeros((fc, W), np.float32)
    blk_lin = np.zeros((fc, W), np.float32)
    for k in range(num_f):
        kc = k if fc == num_f else 0
        lin_slot = explicit_lin and k == 0
        if lin_slot:
            phase_d[2 * k] = 0.0      # sin(0) == 0 exactly
            bias_d[2 * k] = 1.0       # cos slot := exact 1.0
        for w in range(num_ws):
            lane_c = w * dims + 2 * k
            if lin_slot:
                blk_lin[kc, lane_c + 1] = np.float32(lin_lr)
            else:
                coef = np.float32(2.0 * np.pi) * freqs[k]
                blk_coef[kc, lane_c] = coef
                blk_coef[kc, lane_c + 1] = coef

    phase = np.tile(phase_d, num_ws * R)                                  # (W_slab,)
    bias = np.tile(bias_d, num_ws * R)
    const = jnp.asarray(np.stack([phase, bias]))                          # (2, W_slab)

    eye = np.eye(R, dtype=np.float32)
    mats = [np.kron(eye, blk_coef)]                                       # block-diag: (C, W_slab)
    if explicit_lin:
        mats.append(np.kron(eye, blk_lin))
    E = np.stack(mats)                                                    # (n_mats, C, W_slab)
    if C_pad != C:
        E = np.pad(E, ((0, 0), (0, C_pad - C), (0, 0)))
    E = jnp.asarray(E)
    n_mats = int(E.shape[0])

    # ---- packed conditioning input: (B, fc) -> (B_rows, C) -> (B_rows, C_pad)
    c_in = c.astype(jnp.float32).reshape(B_rows, C)
    if C_pad != C:
        c_in = jnp.pad(c_in, ((0, 0), (0, C_pad - C)))

    # ---- adaptive batch tile (roofline-sized output block, >=4 steps when possible)
    out_itemsize = jnp.dtype(out_dtype).itemsize
    bytes_per_row = W_slab * out_itemsize
    rows = max(8, (target_block_bytes // bytes_per_row) // 8 * 8)
    TB = B_rows if rows >= B_rows else rows
    if B_rows >= 4 * 8:                       # keep >=4 grid steps for dual-TC v7x
        TB = min(TB, max(8, ((-(-B_rows // 4)) // 8) * 8))
    grid = pl.cdiv(B_rows, TB)

    vmem_bytes = (2 * TB * W_slab * out_itemsize          # double-buffered output block
                  + 2 * TB * C_pad * 4                    # double-buffered input block
                  + 2 * n_mats * C_pad * W_slab * 4       # resident E
                  + 2 * 2 * W_slab * 4                    # resident phase/bias
                  + (2 << 20))                            # compiler scratch headroom
    vmem_limit = int(min(max(vmem_bytes, 8 << 20), 64 << 20))

    out = pl.pallas_call(
        _make_kernel(explicit_lin),
        out_shape=jax.ShapeDtypeStruct((B_rows, W_slab), out_dtype),
        grid=(grid,),
        in_specs=[
            pl.BlockSpec((TB, C_pad), lambda i: (i, 0)),
            pl.BlockSpec((n_mats, C_pad, W_slab), lambda i: (0, 0, 0)),   # resident constants
            pl.BlockSpec((2, W_slab), lambda i: (0, 0)),                  # resident constants
        ],
        out_specs=pl.BlockSpec((TB, W_slab), lambda i: (i, 0)),
        compiler_params=pltpu.CompilerParams(
            dimension_semantics=("parallel",),
            vmem_limit_bytes=vmem_limit),
    )(c_in, E, const)

    # slab row i, lanes [j*W, (j+1)*W) hold batch row i*R + j  ->  contiguous reshape
    return out.reshape(B, num_ws, dims)


# ---------------------------------------------------------------------------
# Pure numpy reference mirroring the PyTorch forward exactly
# ---------------------------------------------------------------------------
def reference_forward(c_np, *, f_manual, explicit_lin, lin_lr, num_ws):
    freqs = get_frequencies(f_manual, explicit_lin)
    arg = 2.0 * np.pi * freqs[None, :] * c_np            # (B, num_f) via broadcast
    cos = np.cos(arg)
    sin = np.sin(arg)
    if explicit_lin:
        cos[:, 0] = 1.0
        sin[:, 0] = lin_lr * c_np[:, 0]
    out = np.stack((cos, sin), axis=-1).reshape(c_np.shape[0], -1)   # (B, 2*num_f)
    out = np.repeat(out[:, None, :], num_ws, axis=1)                 # (B, num_ws, dims)
    return out.astype(np.float32)


if __name__ == "__main__":
    f_manual = [1.0, 2.0, 4.0]
    lin_lr = 0.01                # cond_args.lin_lr
    num_ws = 8

    key = jax.random.PRNGKey(0)
    k1, k2, k3, k4, k5 = jax.random.split(key, 5)

    def check(c, *, explicit_lin, **kw):
        out = jax.block_until_ready(conditioning_transform(
            c, f_manual=f_manual, explicit_lin=explicit_lin,
            lin_lr=lin_lr, num_ws=num_ws, broadcast=True, **kw))
        ref = reference_forward(np.asarray(c), f_manual=f_manual,
                                explicit_lin=explicit_lin, lin_lr=lin_lr,
                                num_ws=num_ws)
        np.testing.assert_allclose(np.asarray(out), ref, rtol=1e-4, atol=1e-4)

    num_f = len(f_manual) + 1    # incl. -1.0 linear sentinel -> dims = 8, W = 64

    # Case 1: scalar conditioning (B, 1), lane-packed (R=2), single grid step.
    check(jax.random.normal(k1, (16, 1), dtype=jnp.float32), explicit_lin=True)

    # Case 2: per-frequency conditioning (B, num_f); tiny block target forces a
    # 3-step grid with a masked partial last block.
    check(jax.random.normal(k2, (40, num_f), dtype=jnp.float32), explicit_lin=True,
          target_block_bytes=4096)

    # Case 3: odd batch -> lane-packing fallback (R=1, sub-128 minor dim legal
    # because the block covers the full lane extent).
    check(jax.random.normal(k3, (5, 1), dtype=jnp.float32), explicit_lin=True)

    # Case 4: larger batch exercises the >=4-grid-step clamp (dual-TC path on v7x).
    check(jax.random.normal(k4, (512, 1), dtype=jnp.float32), explicit_lin=True)

    # Case 5: explicit_lin=False -> single-matmul kernel variant (no lin / bias lanes).
    check(jax.random.normal(k5, (16, 1), dtype=jnp.float32), explicit_lin=False)

    print("KERNEL_OK")
</pallas_src>

<mosaic_0001>
module attributes {stable_mosaic.version = 11 : i64} {
  func.func @kernel(%arg0: i32, %arg1: memref<8x8xf32, #tpu.memory_space<vmem>>, %arg2: memref<2x8x128xf32, #tpu.memory_space<vmem>>, %arg3: memref<2x128xf32, #tpu.memory_space<vmem>>, %arg4: memref<8x128xf32, #tpu.memory_space<vmem>>) attributes {dimension_semantics = [#tpu.dimension_semantics<parallel>], iteration_bounds = array<i64: 1>, scalar_prefetch = 0 : i64, scratch_operands = 0 : i64, tpu.core_type = #tpu.core_type<tc>, window_params = [{transform_indices = @transform_0, window_bounds = array<i64: 8, 8>}, {pipeline_mode = #tpu.pipeline_mode<synchronous>, transform_indices = @transform_1, window_bounds = array<i64: 2, 8, 128>}, {pipeline_mode = #tpu.pipeline_mode<synchronous>, transform_indices = @transform_2, window_bounds = array<i64: 2, 128>}, {transform_indices = @transform_3, window_bounds = array<i64: 8, 128>}]} {
    %c0 = arith.constant 0 : index
    %c0_0 = arith.constant 0 : index
    %0 = vector.load %arg1[%c0, %c0_0] : memref<8x8xf32, #tpu.memory_space<vmem>>, vector<8x8xf32>
    %c0_1 = arith.constant 0 : index
    %c0_2 = arith.constant 0 : index
    %c0_3 = arith.constant 0 : index
    %1 = vector.load %arg2[%c0_1, %c0_2, %c0_3] : memref<2x8x128xf32, #tpu.memory_space<vmem>>, vector<1x8x128xf32>
    %2 = vector.shape_cast %1 : vector<1x8x128xf32> to vector<8x128xf32>
    %cst = arith.constant dense<0.000000e+00> : vector<8x128xf32>
    %3 = tpu.matmul %0, %2, %cst {dimension_numbers = #tpu.dot_dimension_numbers<[1], [0], [0], [1], [0, 0, 1, 1], [], []>} : vector<8x8xf32>, vector<8x128xf32>, vector<8x128xf32> -> vector<8x128xf32>
    %c0_4 = arith.constant 0 : index
    %c0_5 = arith.constant 0 : index
    %4 = vector.load %arg3[%c0_4, %c0_5] : memref<2x128xf32, #tpu.memory_space<vmem>>, vector<1x128xf32>
    %5 = vector.broadcast %4 : vector<1x128xf32> to vector<8x128xf32>
    %6 = arith.addf %3, %5 : vector<8x128xf32>
    %7 = math.sin %6 : vector<8x128xf32>
    %c1 = arith.constant 1 : index
    %c0_6 = arith.constant 0 : index
    %8 = vector.load %arg3[%c1, %c0_6] : memref<2x128xf32, #tpu.memory_space<vmem>>, vector<1x128xf32>
    %9 = vector.broadcast %8 : vector<1x128xf32> to vector<8x128xf32>
    %10 = arith.addf %7, %9 : vector<8x128xf32>
    %c1_7 = arith.constant 1 : index
    %c0_8 = arith.constant 0 : index
    %c0_9 = arith.constant 0 : index
    %11 = vector.load %arg2[%c1_7, %c0_8, %c0_9] : memref<2x8x128xf32, #tpu.memory_space<vmem>>, vector<1x8x128xf32>
    %12 = vector.shape_cast %11 : vector<1x8x128xf32> to vector<8x128xf32>
    %cst_10 = arith.constant dense<0.000000e+00> : vector<8x128xf32>
    %13 = tpu.matmul %0, %12, %cst_10 {dimension_numbers = #tpu.dot_dimension_numbers<[1], [0], [0], [1], [0, 0, 1, 1], [], []>} : vector<8x8xf32>, vector<8x128xf32>, vector<8x128xf32> -> vector<8x128xf32>
    %14 = arith.addf %10, %13 : vector<8x128xf32>
    %c0_11 = arith.constant 0 : index
    %c0_12 = arith.constant 0 : index
    %15 = vector.load %arg4[%c0_11, %c0_12] : memref<8x128xf32, #tpu.memory_space<vmem>>, vector<8x128xf32>
    tpu.vector_store %arg4[%c0_11, %c0_12], %14 {strides = array<i32>} : memref<8x128xf32, #tpu.memory_space<vmem>>, vector<8x128xf32>,
    return
  }
  func.func @transform_0(%arg0: i32) -> (i32, i32) {
    %c0_i32 = arith.constant 0 : i32
    %c0_i32_0 = arith.constant 0 : i32
    return %arg0, %c0_i32 : i32, i32
  }
  func.func @transform_1(%arg0: i32) -> (i32, i32, i32) {
    %c0_i32 = arith.constant 0 : i32
    %c0_i32_0 = arith.constant 0 : i32
    %c0_i32_1 = arith.constant 0 : i32
    %c0_i32_2 = arith.constant 0 : i32
    return %c0_i32, %c0_i32_0, %c0_i32_1 : i32, i32, i32
  }
  func.func @transform_2(%arg0: i32) -> (i32, i32) {
    %c0_i32 = arith.constant 0 : i32
    %c0_i32_0 = arith.constant 0 : i32
    %c0_i32_1 = arith.constant 0 : i32
    return %c0_i32, %c0_i32_0 : i32, i32
  }
  func.func @transform_3(%arg0: i32) -> (i32, i32) {
    %c0_i32 = arith.constant 0 : i32
    %c0_i32_0 = arith.constant 0 : i32
    return %arg0, %c0_i32 : i32, i32
  }
}

</mosaic_0001>

<bundles_post_ra>
// kernel: tpu_custom_call.1
= control target key start
LH: loop header
LB: loop body
LE: loop exit
PB: predicated region body
PF: predicated region fallthrough
CT: control target
= control target key end

     0   :  { %8 = vsyncpa [#allocation3], 0  ;;  %s503_s0 = inlined_call_operand.hbm [shape: f32[8,8], index: 0, kind: input, shape index: {}]   ;;  %s504_s1 = inlined_call_operand.hbm [shape: f32[2,8,128], index: 1, kind: input, shape index: {}]   ;;  %s505_s2 = inlined_call_operand.vmem [shape: f32[2,128], index: 2, kind: input, shape index: {}]   ;;  %s506_s3 = inlined_call_operand.hbm [shape: f32[8,128], index: 3, kind: output, shape index: {}]  }
   0x1   :  { %9 = vsyncpa [#allocation6], 0 }
   0x2   :  { %10 = vsyncpa [#allocation4], 0  ;;  %s431_s12 = smov [#allocation2]   ;;  %s432_s14 = smov [#allocation5]  }
   0x3   :  { %s17_s13 = sshll.u32 %s431_s12, 4  ;;  %s26_s15 = sshll.u32 %s432_s14, 4  ;;  %s18_s13 = int_to_ptr.vmem [resolvable:$true] %s17_s13  ;;  %s27_s15 = int_to_ptr.vmem [resolvable:$true] %s26_s15 }
   0x4   :  { %s373_s16 = scalar_lea.vmem %s18_s13, 128  ;;  %p378_p1 = scmp.lt.s32.totalorder %s18_s13, %s18_s13 }
   0x5   :  { %p374_p0 = scmp.ne.s32.totalorder %s18_s13, %s373_s16  ;;  %p379_p2 = scmp.lt.s32.totalorder %s373_s16, %s373_s16 }
   0x7   :  { %p380_p3 = por %p379_p2, %p378_p1 }
   0x9   :  { %p381_p4 = pnand %p380_p3, %p374_p0 }
   0xb   :  { %384 = shalt.err (!%p381_p4)
}
   0xc   :  { %20 = dma.hbm_to_vmem [thread:$0]  %s503_s0, 128, %s18_s13, [#allocation3]  }
   0xd   :  { %s393_s19 = scalar_lea.vmem %s27_s15, 256  ;;  %p398_p6 = scmp.lt.s32.totalorder %s27_s15, %s27_s15 }
   0xe   :  { %p394_p5 = scmp.ne.s32.totalorder %s27_s15, %s393_s19  ;;  %p399_p7 = scmp.lt.s32.totalorder %s393_s19, %s393_s19 }
  0x10   :  { %p400_p8 = por %p399_p7, %p398_p6 }
  0x12   :  { %p401_p9 = pnand %p400_p8, %p394_p5 }
  0x14   :  { %404 = shalt.err (!%p401_p9)
}
  0x15   :  { %s433_s20 = smov 128   ;;  %s434_s21 = smov 8  }
  0x16   :  { %32 = dma.hbm_to_vmem [thread:$0]  %s504_s1, 256, %s27_s15, [#allocation6], %s433_s20, %s433_s20, %s434_s21  }
  0x17   :  { %425 = dma.done.wait [#allocation3], 128  }
  0x18   :  { %426 = vsyncadd [#allocation3], 4294967168 }
  0x19   :  { %427 = dma.done.wait [#allocation6], 256  }
  0x1a   :  { %428 = vsyncadd [#allocation6], 4294967040  ;;  %v435_v0 = vmov 0.0   ;;  %vm436_vm0 = vmmov 0   ;;  %vm48_vm1 = vcmask 64512   ;;  %v42_v1 = vld [vmem:[#allocation5] sm:$0xff] }
  0x1b   :  { %334 = vmatprep.subr.mxu0 %v435_v0  ;;  %336 = vmatprep.mubr.msk.f32.mxu0 %vm436_vm0, %v435_v0  ;;  %v41_v2 = vld [vmem:[#allocation2] sm:$0xff]  ;;  %v233_v3 = vld [vmem:[#allocation5 + $0x8] sm:$0xff]  ;;  %v437_v20 = vmov 683565275   ;;  %v438_v22 = vmov 2475754826  }
  0x1c   :  { %339 = vmatprep.subr.mxu1 %v435_v0  ;;  %341 = vmatprep.mubr.msk.f32.mxu1 %vm436_vm0, %v435_v0  ;;  %v322_v4 = vld [vmem:[%s505_s2] ss:$0 sm:$0xff]  ;;  %v439_v25 = vmov 2131351028   ;;  %v440_v28 = vmov 2102212464  }
  0x1d   :  { %335 = vmatpush3.msra.mxu0 %v42_v1  ;;  %340 = vmatpush3.msra.mxu1 %v233_v3  ;;  %v441_v31 = vmov 920167782   ;;  %v442_v34 = vmov 1326507024   ;;  %s443_s26 = smov [#allocation7]  }
  0x1e   :  { %337 = vmatmul.mubr.msk.f32.vlgmr.msra.gmra.mxu0 %vm48_vm1, %v41_v2  ;;  %342 = vmatmul.mubr.msk.f32.vlgmr.msra.gmra.mxu1 %vm48_vm1, %v41_v2  ;;  %s312_s27 = sshll.u32 %s443_s26, 4  ;;  %s313_s27 = int_to_ptr.vmem [resolvable:$true] %s312_s27 }
  0x1f   :  { %s405_s28 = scalar_lea.vmem %s313_s27, 128  ;;  %p410_p11 = scmp.lt.s32.totalorder %s313_s27, %s313_s27 }
  0x20   :  { %p406_p10 = scmp.ne.s32.totalorder %s313_s27, %s405_s28  ;;  %p411_p12 = scmp.lt.s32.totalorder %s405_s28, %s405_s28 }
  0x22   :  { %p412_p13 = por %p411_p12, %p410_p11 }
  0x24   :  { %p413_p0 = pnand %p412_p13, %p406_p10 }
  0xde   :  { %v118_v5 = vpop.f32.mrf.mxu0  ;;  %v473_v6 = vpop.f32.mrf.mxu1 }
  0xdf   :  { %v475_v7 = vadd.f32 %v322_v4, %v118_v5 }
  0xe0   :  { %v338_v8 = vpop.f32.mrf.mxu0  ;;  %v343_v9 = vpop.f32.mrf.mxu1 }
  0xe1   :  { %v125_v10 = vand.u32 2139095040, %v475_v7  ;;  %v122_v14 = vand.u32 2147483647, %v475_v7  ;;  %vm124_vm9 = vcmp.lt.s32.totalorder %v475_v7, 0  ;;  %vm214_vm14 = vweird.f32 %v475_v7 }
  0xe3   :  { %v126_v11 = vshrl.u32 %v125_v10, 23  ;;  %v129_v17 = vand.u32 8388607, %v122_v14  ;;  %vm123_vm10 = vcmp.le.f32.partialorder %v122_v14, 0.7853982 }
  0xe4   :  { %v328_v14 = vld [vmem:[%s505_s2 + $0x1] ss:$0 sm:$0xff] }
  0xe5   :  { %v324_v12 = vadd.s32 4294967169, %v126_v11  ;;  %v130_v36 = vor.u32 8388608, %v129_v17 }
  0xe7   :  { %v132_v13 = vadd.s32 1, %v324_v12  ;;  %v170_v50 = vshll.u32 %v130_v36, 8 }
  0xe9   :  { %vm133_vm2 = vcmp.gt.s32.totalorder %v132_v13, 0 }
  0xea   :  { %v134_v15 = vsel %vm133_vm2, %v132_v13, 0 }
  0xeb   :  { %v136_v16 = vand.u32 31, %v134_v15  ;;  %v135_v19 = vshrl.u32 %v134_v15, 5 }
  0xed   :  { %v137_v18 = vsub.s32 32, %v136_v16  ;;  %v139_v21 = vshll.u32 %v437_v20, %v136_v16  ;;  %v142_v23 = vshll.u32 %v438_v22, %v136_v16  ;;  %v145_v27 = vshll.u32 %v439_v25, %v136_v16 }
  0xee   :  { %v148_v30 = vshll.u32 %v440_v28, %v136_v16  ;;  %v151_v33 = vshll.u32 %v441_v31, %v136_v16  ;;  %vm154_vm3 = vcmp.lt.s32.totalorder %v135_v19, 1  ;;  %vm157_vm4 = vcmp.lt.s32.totalorder %v135_v19, 4 }
  0xef   :  { %v140_v24 = vshrl.u32 %v438_v22, %v137_v18  ;;  %v143_v26 = vshrl.u32 %v439_v25, %v137_v18  ;;  %v146_v29 = vshrl.u32 %v440_v28, %v137_v18  ;;  %v149_v32 = vshrl.u32 %v441_v31, %v137_v18 }
  0xf0   :  { %v152_v35 = vshrl.u32 %v442_v34, %v137_v18  ;;  %v138_v45 = vshrl.u32 %v437_v20, %v137_v18  ;;  %vm156_vm5 = vcmp.lt.s32.totalorder %v135_v19, 3  ;;  %vm155_vm6 = vcmp.lt.s32.totalorder %v135_v19, 2 }
  0xf1   :  { %v141_v37 = vor.u32 %v140_v24, %v139_v21  ;;  %v144_v38 = vor.u32 %v143_v26, %v142_v23  ;;  %v147_v39 = vor.u32 %v146_v29, %v145_v27  ;;  %v150_v40 = vor.u32 %v149_v32, %v148_v30 }
  0xf2   :  { %v153_v41 = vor.u32 %v152_v35, %v151_v33 }
  0xf3   :  { %v159_v42 = vsel %vm157_vm4, %v147_v39, 2102212464  ;;  %v162_v43 = vsel %vm154_vm3, %v141_v37, %v144_v38  ;;  %v166_v44 = vsel %vm154_vm3, %v144_v38, %v147_v39  ;;  %v163_v46 = vsel %vm157_vm4, %v150_v40, 920167782 }
  0xf4   :  { %v167_v47 = vsel %vm157_vm4, %v153_v41, 1326507024  ;;  %v164_v48 = vsel %vm156_vm5, %v147_v39, %v163_v46  ;;  %v158_v51 = vsel %vm154_vm3, %v138_v45, %v141_v37  ;;  %v160_v52 = vsel %vm156_vm5, %v144_v38, %v159_v42 }
  0xf5   :  { %v168_v49 = vsel %vm156_vm5, %v150_v40, %v167_v47  ;;  %v165_v53 = vsel %vm155_vm6, %v162_v43, %v164_v48  ;;  %v161_v59 = vsel %vm155_vm6, %v158_v51, %v160_v52 }
  0xf6   :  { %v169_v54 = vsel %vm155_vm6, %v166_v44, %v168_v49  ;;  %v484_v57 = vmul.u32.u64.low %v170_v50, %v165_v53  ;;  %v485_v58 = vmul.u32.u64.high %v170_v50, %v165_v53, %v484_v57  ;;  %v177_v61 = vmul.u32 %v170_v50, %v161_v59 }
  0xf7   :  { %v481_v55 = vmul.u32.u64.low %v170_v50, %v169_v54  ;;  %v482_v56 = vmul.u32.u64.high %v170_v50, %v169_v54, %v481_v55 }
  0xf8   :  { %v180_v60 = vadd.s32 1, %v485_v58 }
  0xf9   :  { %vm179_vm7 = vc.u32 %v482_v56, %v484_v57  ;;  %v178_v11 = vadd.s32 %v484_v57, %v482_v56 }
  0xfa   :  { %v181_v62 = vsel %vm179_vm7, %v180_v60, %v485_v58 }
  0xfb   :  { %v182_v63 = vadd.s32 %v181_v62, %v177_v61 }
  0xfd   :  { %v183_v0 = vadd.s32 536870912, %v182_v63 }
  0xff   :  { %v184_v1 = vshrl.u32 %v183_v0, 30 }
 0x101   :  { %v185_v2 = vshll.u32 %v184_v1, 30  ;;  %v208_v25 = vsub.s32 4, %v184_v1 }
 0x103   :  { %v186_v3 = vsub.s32 %v182_v63, %v185_v2  ;;  %v209_v28 = vsel %vm124_vm9, %v208_v25, %v184_v1 }
 0x104   :  { %v211_v29 = vsel %vm123_vm10, 0, %v209_v28 }
 0x105   :  { %v188_v4 = vsub.s32 0, %v186_v3  ;;  %v215_v30 = vadd.s32 3, %v211_v29 }
 0x107   :  { %v325_v5 = vmin.u32 %v188_v4, %v186_v3  ;;  %v216_v31 = vand.u32 3, %v215_v30 }
 0x109   :  { %v190_v8 = vclz %v325_v5  ;;  %vm221_vm11 = vcmp.eq.s32.totalorder %v216_v31, 2  ;;  %vm218_vm12 = vcmp.eq.s32.totalorder %v216_v31, 0  ;;  %vm217_vm13 = vcmp.lt.s32.totalorder %v216_v31, 2 }
 0x10b   :  { %v326_v9 = vadd.s32 4294967294, %v190_v8 }
 0x10d   :  { %vm327_vm8 = vcmp.lt.s32.totalorder %v326_v9, 0 }
 0x10e   :  { %v193_v10 = vsel %vm327_vm8, 0, %v326_v9 }
 0x10f   :  { %v194_v12 = vsub.s32 32, %v193_v10  ;;  %v198_v13 = vsub.s32 4294967266, %v193_v10  ;;  %v195_v15 = vshll.u32 %v186_v3, %v193_v10 }
 0x111   :  { %v196_v16 = vshrl.u32 %v178_v11, %v194_v12  ;;  %v199_v17 = vadd.s32 127, %v198_v13 }
 0x113   :  { %v197_v18 = vor.u32 %v196_v16, %v195_v15  ;;  %v200_v19 = vshll.u32 %v199_v17, 23 }
 0x115   :  { %v201_v20 = vor.u32 4788187, %v200_v19  ;;  %v204_v22 = vcvt.s32.f32 %v197_v18 }
 0x117   :  { %v202_v21 = vand.u32 2147483647, %v201_v20 }
 0x119   :  { %v205_v23 = vmul.f32 %v204_v22, %v202_v21 }
 0x11b   :  { %v206_v24 = vxor.u32 2147483648, %v205_v23 }
 0x11d   :  { %v207_v26 = vsel %vm124_vm9, %v206_v24, %v205_v23 }
 0x11e   :  { %v210_v27 = vsel %vm123_vm10, %v475_v7, %v207_v26 }
 0x11f   :  { %361 = vcosq.f32 %v210_v27 }
 0x120   :  { %363 = vsinq.f32 %v210_v27 }
 0x12c   :  { %v362_v32 = vpop.eup %361 }
 0x12d   :  { %v364_v33 = vpop.eup %363  ;;  %v222_v34 = vxor.u32 2147483648, %v362_v32 }
 0x12e   :  { %v219_v35 = vxor.u32 2147483648, %v364_v33 }
 0x12f   :  { %v223_v36 = vsel %vm221_vm11, %v222_v34, %v364_v33 }
 0x130   :  { %v220_v37 = vsel %vm218_vm12, %v362_v32, %v219_v35 }
 0x131   :  { %v224_v38 = vsel %vm217_vm13, %v220_v37, %v223_v36 }
 0x132   :  { %v225_v39 = vsel %vm214_vm14, nan, %v224_v38 }
 0x133   :  { %v231_v40 = vadd.f32 %v328_v14, %v225_v39 }
 0x135   :  { %v304_v41 = vadd.f32 %v473_v6, %v231_v40 }
 0x137   :  { %305 = vst [vmem:[#allocation7] sm:$0xff] %v304_v41 }
 0x138   :  { %416 = shalt.err (!%p413_p0)
}
 0x139   :  { %315 = dma.vmem_to_hbm [thread:$0]  %s313_s27, 128, %s506_s3, [#allocation4]  }
 0x13a   :  { %429 = dma.done.wait [#allocation4], 128  }
 0x13b   :  { %430 = vsyncadd [#allocation4], 4294967168 }
 0x13c   :  { %319 = vsyncpa [#allocation3], 1 }
 0x13d   :  { %320 = vsyncpa [#allocation6], 1 }
 0x13e   :  { %321 = vsyncpa [#allocation4], 1 }

</bundles_post_ra>
